<compile_context>
chip_gen: v7x
topology: tpu7x:2x2x1
jax: 0.10.0
libtpu: 0.0.40
codegen_flags: <defaults>
</compile_context>

<pallas_src>
import functools

import jax
import jax.numpy as jnp
import numpy as np
from jax.experimental import pallas as pl
from jax.experimental.pallas import tpu as pltpu

L_IN = 420      # conv input length (15 * 28, implied by fc1 = Linear(32*15, 32))
K = 28          # conv kernel size == stride
L_OUT = 15      # conv output length
C_OUT = 32      # conv out channels
HID = 32        # fc hidden width
F = L_OUT * C_OUT   # 480 = flattened conv feature width


# ----------------------------- kernels -------------------------------------

def _infer_kernel(x_ref, wbd_ref, bbd_ref, w1r_ref, b1_ref, out_ref):
    # conv1 (block-diagonal) + bias + relu:  (TB,420) @ (420,480) -> (TB,480)
    h = jnp.dot(x_ref[...], wbd_ref[...], preferred_element_type=jnp.float32)
    h = jnp.maximum(h + bbd_ref[...], 0.0)
    # fc1 + relu:  (TB,480) @ (480,32) -> (TB,32)
    y = jnp.dot(h, w1r_ref[...], preferred_element_type=jnp.float32)
    out_ref[...] = jnp.maximum(y + b1_ref[...], 0.0)


def _train_kernel(x_ref, wbd_ref, bbd_ref, w1r_ref, b1_ref,
                  w2t_ref, b2_ref, w3t_ref, b3_ref, out_ref):
    h = jnp.dot(x_ref[...], wbd_ref[...], preferred_element_type=jnp.float32)
    h = jnp.maximum(h + bbd_ref[...], 0.0)
    y = jnp.dot(h, w1r_ref[...], preferred_element_type=jnp.float32)
    y = jnp.maximum(y + b1_ref[...], 0.0)
    z = jnp.dot(y, w2t_ref[...], preferred_element_type=jnp.float32)
    z = jnp.maximum(z + b2_ref[...], 0.0)
    logit = jnp.dot(z, w3t_ref[...], preferred_element_type=jnp.float32) + b3_ref[...]
    out_ref[...] = jax.nn.sigmoid(logit)


# ----------------------------- wrapper --------------------------------------

def init_params(key):
    """Deterministic init matching PyTorch default (uniform +/- 1/sqrt(fan_in))."""
    ks = jax.random.split(key, 8)

    def u(k, shape, fan_in):
        bound = 1.0 / np.sqrt(fan_in)
        return jax.random.uniform(k, shape, jnp.float32, -bound, bound)

    wc = u(ks[0], (C_OUT, 1, K), 1 * K)                 # conv1.weight (32, 1, 28)
    bc = u(ks[1], (C_OUT,), 1 * K)                      # conv1.bias   (32,)
    w1 = u(ks[2], (HID, F), F)                          # fc1.weight (32, 480)
    b1 = u(ks[3], (HID,), F)
    w2 = u(ks[4], (HID, HID), HID)                      # fc2.weight (32, 32)
    b2 = u(ks[5], (HID,), HID)
    w3 = u(ks[6], (1, HID), HID)                        # fc3.weight (1, 32)
    b3 = u(ks[7], (1,), HID)
    return (wc, bc, w1, b1, w2, b2, w3, b3)


def _prep_weights(params):
    """Re-layout torch weights so the kernel does only (B,K)@(K,N) matmuls."""
    wc, bc, w1, b1, w2, b2, w3, b3 = params
    wct = jnp.transpose(wc[:, 0, :]).astype(jnp.float32)         # (28, 32)  [k, c]
    # Block-diagonal conv weight: wbd[l*28+k, m*32+c] = wct[k,c] if l == m.
    eye = jnp.eye(L_OUT, dtype=jnp.float32)
    wbd = jnp.einsum('lm,kc->lkmc', eye, wct).reshape(L_IN, F)   # (420, 480)
    bbd = jnp.tile(bc, L_OUT).reshape(1, F)                      # (1, 480)  [l*32+c] -> bc[c]
    # torch flatten column index = c*15 + l  ->  rows re-ordered to [l, c].
    w1r = jnp.transpose(w1.reshape(HID, C_OUT, L_OUT), (2, 1, 0)).reshape(F, HID)  # (480, 32)
    b1r = b1.reshape(1, HID)
    w2t = jnp.transpose(w2)                                      # (32, 32)
    b2r = b2.reshape(1, HID)
    w3t = jnp.transpose(w3)                                      # (32, 1)
    b3r = b3.reshape(1, 1)
    return wbd, bbd, w1r, b1r, w2t, b2r, w3t, b3r


def _batch_tiles(B):
    """Pick a batch tile (multiple of 8, capped so double-buffered blocks stay
    well under the 16 MiB default scoped VMEM of v5e; ~10 MiB at TB=2048) and
    the padded batch size."""
    TB = min(2048, max(8, ((B + 7) // 8) * 8))
    Bp = ((B + TB - 1) // TB) * TB
    return TB, Bp


@functools.partial(jax.jit, static_argnames=('key',))
def track_network(x, params, key=None):
    """x: (B, 1, 420) float32 -- NCHW-style Conv1d input."""
    B = x.shape[0]
    x_flat = x.reshape(B, L_IN).astype(jnp.float32)              # lane-dense (B, 420)
    wbd, bbd, w1r, b1r, w2t, b2r, w3t, b3r = _prep_weights(params)

    TB, Bp = _batch_tiles(B)
    if Bp != B:
        x_flat = jnp.pad(x_flat, ((0, Bp - B), (0, 0)))
    grid = (Bp // TB,)

    def wspec(shape):
        # weights/biases: full block, constant index -> resident in VMEM
        return pl.BlockSpec(shape, lambda i: (0, 0))

    x_spec = pl.BlockSpec((TB, L_IN), lambda i: (i, 0))
    cp = pltpu.CompilerParams(dimension_semantics=("parallel",))

    if key == 'train':
        out = pl.pallas_call(
            _train_kernel,
            out_shape=jax.ShapeDtypeStruct((Bp, 1), jnp.float32),
            grid=grid,
            in_specs=[x_spec,
                      wspec((L_IN, F)), wspec((1, F)),
                      wspec((F, HID)), wspec((1, HID)),
                      wspec((HID, HID)), wspec((1, HID)),
                      wspec((HID, 1)), wspec((1, 1))],
            out_specs=pl.BlockSpec((TB, 1), lambda i: (i, 0)),
            compiler_params=cp,
        )(x_flat, wbd, bbd, w1r, b1r, w2t, b2r, w3t, b3r)
    else:
        out = pl.pallas_call(
            _infer_kernel,
            out_shape=jax.ShapeDtypeStruct((Bp, HID), jnp.float32),
            grid=grid,
            in_specs=[x_spec,
                      wspec((L_IN, F)), wspec((1, F)),
                      wspec((F, HID)), wspec((1, HID))],
            out_specs=pl.BlockSpec((TB, HID), lambda i: (i, 0)),
            compiler_params=cp,
        )(x_flat, wbd, bbd, w1r, b1r)

    return out[:B]


# ----------------------------- reference ------------------------------------

def reference(x, params, key=None):
    """Plain-JAX reference matching the PyTorch forward exactly."""
    wc, bc, w1, b1, w2, b2, w3, b3 = params
    B = x.shape[0]
    patches = x.reshape(B, L_OUT, K)
    conv = jnp.einsum('blk,ck->bcl', patches, wc[:, 0, :]) + bc[None, :, None]  # (B, 32, 15)
    h = jax.nn.relu(conv).reshape(B, -1)                                        # (B, 480)
    y = jax.nn.relu(h @ w1.T + b1)
    if key == 'train':
        z = jax.nn.relu(y @ w2.T + b2)
        return jax.nn.sigmoid(z @ w3.T + b3)
    return y


if __name__ == "__main__":
    root = jax.random.PRNGKey(0)
    k_param, k_x = jax.random.split(root)
    params = init_params(k_param)

    # small batch (pads 2 -> 8)
    B = 2
    x = jax.random.normal(k_x, (B, 1, L_IN), jnp.float32)
    out_inf = jax.block_until_ready(track_network(x, params, key=None))       # (B, 32)
    out_train = jax.block_until_ready(track_network(x, params, key='train'))  # (B, 1)
    np.testing.assert_allclose(np.asarray(out_inf), np.asarray(reference(x, params, None)),
                               rtol=1e-5, atol=1e-5)
    np.testing.assert_allclose(np.asarray(out_train), np.asarray(reference(x, params, 'train')),
                               rtol=1e-5, atol=1e-5)
    assert out_inf.shape == (B, HID) and out_train.shape == (B, 1)

    # non-multiple-of-8 batch to exercise padding + slice-back
    B2 = 37
    x2 = jax.random.normal(jax.random.PRNGKey(7), (B2, 1, L_IN), jnp.float32)
    out2 = jax.block_until_ready(track_network(x2, params, key=None))
    np.testing.assert_allclose(np.asarray(out2), np.asarray(reference(x2, params, None)),
                               rtol=1e-5, atol=1e-5)
    assert out2.shape == (B2, HID)

    print("KERNEL_OK")
</pallas_src>

<mosaic_0001>
module attributes {stable_mosaic.version = 11 : i64} {
  func.func @_infer_kernel(%arg0: i32, %arg1: memref<8x420xf32, #tpu.memory_space<vmem>>, %arg2: memref<420x480xf32, #tpu.memory_space<vmem>>, %arg3: memref<1x480xf32, #tpu.memory_space<vmem>>, %arg4: memref<480x32xf32, #tpu.memory_space<vmem>>, %arg5: memref<1x32xf32, #tpu.memory_space<vmem>>, %arg6: memref<8x32xf32, #tpu.memory_space<vmem>>) attributes {dimension_semantics = [#tpu.dimension_semantics<parallel>], iteration_bounds = array<i64: 1>, scalar_prefetch = 0 : i64, scratch_operands = 0 : i64, tpu.core_type = #tpu.core_type<tc>, window_params = [{transform_indices = @transform_0, window_bounds = array<i64: 8, 420>}, {pipeline_mode = #tpu.pipeline_mode<synchronous>, transform_indices = @transform_1, window_bounds = array<i64: 420, 480>}, {pipeline_mode = #tpu.pipeline_mode<synchronous>, transform_indices = @transform_2, window_bounds = array<i64: 1, 480>}, {pipeline_mode = #tpu.pipeline_mode<synchronous>, transform_indices = @transform_3, window_bounds = array<i64: 480, 32>}, {pipeline_mode = #tpu.pipeline_mode<synchronous>, transform_indices = @transform_4, window_bounds = array<i64: 1, 32>}, {transform_indices = @transform_5, window_bounds = array<i64: 8, 32>}]} {
    %c0 = arith.constant 0 : index
    %c0_0 = arith.constant 0 : index
    %0 = vector.load %arg1[%c0, %c0_0] : memref<8x420xf32, #tpu.memory_space<vmem>>, vector<8x420xf32>
    %c0_1 = arith.constant 0 : index
    %c0_2 = arith.constant 0 : index
    %1 = vector.load %arg2[%c0_1, %c0_2] : memref<420x480xf32, #tpu.memory_space<vmem>>, vector<420x480xf32>
    %cst = arith.constant dense<0.000000e+00> : vector<8x480xf32>
    %2 = tpu.matmul %0, %1, %cst {dimension_numbers = #tpu.dot_dimension_numbers<[1], [0], [0], [1], [0, 0, 1, 1], [], []>} : vector<8x420xf32>, vector<420x480xf32>, vector<8x480xf32> -> vector<8x480xf32>
    %c0_3 = arith.constant 0 : index
    %c0_4 = arith.constant 0 : index
    %3 = vector.load %arg3[%c0_3, %c0_4] : memref<1x480xf32, #tpu.memory_space<vmem>>, vector<1x480xf32>
    %4 = vector.broadcast %3 : vector<1x480xf32> to vector<8x480xf32>
    %5 = arith.addf %2, %4 : vector<8x480xf32>
    %cst_5 = arith.constant 0.000000e+00 : f32
    %6 = vector.broadcast %cst_5 : f32 to vector<8x480xf32>
    %7 = arith.maximumf %5, %6 : vector<8x480xf32>
    %c0_6 = arith.constant 0 : index
    %c0_7 = arith.constant 0 : index
    %8 = vector.load %arg4[%c0_6, %c0_7] : memref<480x32xf32, #tpu.memory_space<vmem>>, vector<480x32xf32>
    %cst_8 = arith.constant dense<0.000000e+00> : vector<8x32xf32>
    %9 = tpu.matmul %7, %8, %cst_8 {dimension_numbers = #tpu.dot_dimension_numbers<[1], [0], [0], [1], [0, 0, 1, 1], [], []>} : vector<8x480xf32>, vector<480x32xf32>, vector<8x32xf32> -> vector<8x32xf32>
    %c0_9 = arith.constant 0 : index
    %c0_10 = arith.constant 0 : index
    %10 = vector.load %arg5[%c0_9, %c0_10] : memref<1x32xf32, #tpu.memory_space<vmem>>, vector<1x32xf32>
    %11 = vector.broadcast %10 : vector<1x32xf32> to vector<8x32xf32>
    %12 = arith.addf %9, %11 : vector<8x32xf32>
    %cst_11 = arith.constant 0.000000e+00 : f32
    %13 = vector.broadcast %cst_11 : f32 to vector<8x32xf32>
    %14 = arith.maximumf %12, %13 : vector<8x32xf32>
    %c0_12 = arith.constant 0 : index
    %c0_13 = arith.constant 0 : index
    %15 = vector.load %arg6[%c0_12, %c0_13] : memref<8x32xf32, #tpu.memory_space<vmem>>, vector<8x32xf32>
    tpu.vector_store %arg6[%c0_12, %c0_13], %14 {strides = array<i32>} : memref<8x32xf32, #tpu.memory_space<vmem>>, vector<8x32xf32>,
    return
  }
  func.func @transform_0(%arg0: i32) -> (i32, i32) {
    %c0_i32 = arith.constant 0 : i32
    %c0_i32_0 = arith.constant 0 : i32
    return %arg0, %c0_i32 : i32, i32
  }
  func.func @transform_1(%arg0: i32) -> (i32, i32) {
    %c0_i32 = arith.constant 0 : i32
    %c0_i32_0 = arith.constant 0 : i32
    %c0_i32_1 = arith.constant 0 : i32
    return %c0_i32, %c0_i32_0 : i32, i32
  }
  func.func @transform_2(%arg0: i32) -> (i32, i32) {
    %c0_i32 = arith.constant 0 : i32
    %c0_i32_0 = arith.constant 0 : i32
    %c0_i32_1 = arith.constant 0 : i32
    return %c0_i32, %c0_i32_0 : i32, i32
  }
  func.func @transform_3(%arg0: i32) -> (i32, i32) {
    %c0_i32 = arith.constant 0 : i32
    %c0_i32_0 = arith.constant 0 : i32
    %c0_i32_1 = arith.constant 0 : i32
    return %c0_i32, %c0_i32_0 : i32, i32
  }
  func.func @transform_4(%arg0: i32) -> (i32, i32) {
    %c0_i32 = arith.constant 0 : i32
    %c0_i32_0 = arith.constant 0 : i32
    %c0_i32_1 = arith.constant 0 : i32
    return %c0_i32, %c0_i32_0 : i32, i32
  }
  func.func @transform_5(%arg0: i32) -> (i32, i32) {
    %c0_i32 = arith.constant 0 : i32
    %c0_i32_0 = arith.constant 0 : i32
    return %arg0, %c0_i32 : i32, i32
  }
}

</mosaic_0001>

<bundles_post_ra>
// kernel: tile.8
= control target key start
LH: loop header
LB: loop body
LE: loop exit
PB: predicated region body
PF: predicated region fallthrough
CT: control target
= control target key end

     0   :  { %s28_s0 = inlined_call_operand.vmem [shape: f32[32], index: 0, kind: input, shape index: {}]   ;;  %s29_s1 = inlined_call_operand.vmem [shape: f32[15,32], index: 1, kind: output, shape index: {}]  }
   0x1   :  { %v4_v0 = vld [vmem:[%s28_s0] ss:$0 sm:$0xff] }
   0x2   :  { %5 = vst [vmem:[%s29_s1] sm:$0xff] %v4_v0  ;;  %8 = vst [vmem:[%s29_s1 + $0x8] sm:$0xff] %v4_v0 }

// kernel: tile.9
= control target key start
LH: loop header
LB: loop body
LE: loop exit
PB: predicated region body
PF: predicated region fallthrough
CT: control target
= control target key end

     0   :  { %s57_s8 = smov 96   ;;  %vm3_vm0 = vcmask 261120   ;;  %s59_s15 = smov 64   ;;  %vm9_vm1 = vcmask 1048320   ;;  %vm15_vm2 = vcmask 785920   ;;  %vm21_vm3 = vcmask 523520   ;;  %s94_s0 = inlined_call_operand.vmem [shape: f32[15,32], index: 0, kind: input, shape index: {}]   ;;  %s95_s1 = inlined_call_operand.vmem [shape: f32[1,480], index: 1, kind: output, shape index: {}]  }
   0x1   :  { %v48_v0 = vld [vmem:[%s94_s0 + $0x3] ss:$4 sm:$0x7]   ;;  %v49_v1 = vld [vmem:[%s94_s0 + $0x2] ss:$4 sm:$0xf]  }
   0x2   :  { %7 = vrot.lane.b32.xlu0 %v48_v0, %s57_s8  ;;  %v50_v2 = vld [vmem:[%s94_s0 + $0x1] ss:$4 sm:$0xf]   ;;  %v2_v3 = vld [vmem:[%s94_s0] ss:$4 sm:$0xf]  }
   0x3   :  { %s58_s0 = smov 32   ;;  %4 = vst.msk [vmem:[#allocation0] ss:$8 sm:$0xf] %vm3_vm0, %v2_v3  }
   0x4   :  { %19 = vrot.lane.b32.xlu1 %v50_v2, %s58_s0 }
   0x6   :  { %13 = vrot.lane.b32.xlu0 %v49_v1, %s59_s15 }
  0x74   :  { %v8_v4 = vpop.permute.xlu0 %7  }
  0x75   :  { %10 = vst.msk [vmem:[#allocation0] ss:$8 sm:$0x7] %vm9_vm1, %v8_v4  }
  0x76   :  { %v20_v5 = vpop.permute.xlu1 %19  }
  0x78   :  { %v14_v6 = vpop.permute.xlu0 %13  }
  0x79   :  { %16 = vst.msk [vmem:[#allocation0] ss:$8 sm:$0xf] %vm15_vm2, %v14_v6  }
  0x7a   :  { %22 = vst.msk [vmem:[#allocation0] ss:$8 sm:$0xf] %vm21_vm3, %v20_v5  }
  0x81   :  { %v26_v7 = vld [vmem:[#allocation0] sm:$0x1]  ;;  %v30_v8 = vld [vmem:[#allocation0 + $0x8] sm:$0x1]  ;;  %v35_v9 = vld [vmem:[#allocation0 + $0x10] sm:$0x1] }
  0x82   :  { %28 = vst [vmem:[%s95_s1] sm:$0x1] %v26_v7  ;;  %51 = vst [vmem:[%s95_s1 + $0x1] sm:$0x1] %v30_v8  ;;  %v41_v10 = vld [vmem:[#allocation0 + $0x18] sm:$0x1] }
  0x83   :  { %52 = vst [vmem:[%s95_s1 + $0x2] sm:$0x1] %v35_v9  ;;  %53 = vst [vmem:[%s95_s1 + $0x3] sm:$0x1] %v41_v10 }

// kernel: track_network.1
= control target key start
LH: loop header
LB: loop body
LE: loop exit
PB: predicated region body
PF: predicated region fallthrough
CT: control target
= control target key end

     0   :  { %vm258_vm0 = vcmask 293888   ;;  %vm262_vm1 = vcmask 1043456   ;;  %vm630_vm2 = vcmask 785408   ;;  %vm775_vm3 = vcmask 261120   ;;  %s2003_s1 = inlined_call_operand.vmem [shape: f32[420,480], index: 1, kind: input, shape index: {}]   ;;  %s2004_s0 = inlined_call_operand.vmem [shape: f32[8,420], index: 0, kind: input, shape index: {}]   ;;  %s2005_s3 = inlined_call_operand.vmem [shape: f32[480,32], index: 3, kind: input, shape index: {}]   ;;  %s2006_s2 = inlined_call_operand.vmem [shape: f32[1,480], index: 2, kind: input, shape index: {}]   ;;  %s2007_s4 = inlined_call_operand.vmem [shape: f32[1,32], index: 4, kind: input, shape index: {}]   ;;  %s2008_s5 = inlined_call_operand.vmem [shape: f32[8,32], index: 5, kind: output, shape index: {}]  }
   0x1   :  { %v25_v0 = vld [vmem:[%s2003_s1 + $0x8] sm:$0xff]  ;;  %v27_v2 = vld [vmem:[%s2003_s1 + $0x18] sm:$0xff]  ;;  %v24_v5 = vld [vmem:[%s2003_s1] sm:$0xff] }
   0x2   :  { %v29_v1 = vld [vmem:[%s2003_s1 + $0x28] sm:$0xff]  ;;  %v31_v4 = vld [vmem:[%s2003_s1 + $0x38] sm:$0xff]  ;;  %v28_v6 = vld [vmem:[%s2003_s1 + $0x20] sm:$0xff] }
   0x3   :  { %v824_v3 = vpack.c.bf16 %v29_v1, %v25_v0  ;;  %v928_v7 = vpack.c.bf16 %v31_v4, %v27_v2  ;;  %v826_v8 = vpack.c.bf16 %v28_v6, %v24_v5  ;;  %v26_v9 = vld [vmem:[%s2003_s1 + $0x10] sm:$0xff]  ;;  %v33_v11 = vld [vmem:[%s2003_s1 + $0x48] sm:$0xff]  ;;  %v35_v14 = vld [vmem:[%s2003_s1 + $0x58] sm:$0xff] }
   0x4   :  { %v30_v10 = vld [vmem:[%s2003_s1 + $0x30] sm:$0xff]  ;;  %v37_v13 = vld [vmem:[%s2003_s1 + $0x68] sm:$0xff]  ;;  %v39_v15 = vld [vmem:[%s2003_s1 + $0x78] sm:$0xff] }
   0x5   :  { %825 = vmatprep.subr.bf16.mxu0 %v824_v3  ;;  %v930_v12 = vpack.c.bf16 %v30_v10, %v26_v9  ;;  %929 = vmatprep.subr.bf16.mxu1 %v928_v7  ;;  %v828_v16 = vpack.c.bf16 %v37_v13, %v33_v11  ;;  %v932_v17 = vpack.c.bf16 %v39_v15, %v35_v14  ;;  %v32_v18 = vld [vmem:[%s2003_s1 + $0x40] sm:$0xff]  ;;  %v34_v20 = vld [vmem:[%s2003_s1 + $0x50] sm:$0xff]  ;;  %v41_v23 = vld [vmem:[%s2003_s1 + $0x88] sm:$0xff] }
   0x6   :  { %827 = vmatpush1.bf16.msra.mxu0 %v826_v8  ;;  %v36_v19 = vld [vmem:[%s2003_s1 + $0x60] sm:$0xff]  ;;  %v38_v22 = vld [vmem:[%s2003_s1 + $0x70] sm:$0xff]  ;;  %v45_v24 = vld [vmem:[%s2003_s1 + $0xa8] sm:$0xff] }
   0x7   :  { %931 = vmatpush1.bf16.msra.mxu1 %v930_v12  ;;  %v830_v21 = vpack.c.bf16 %v36_v19, %v32_v18  ;;  %829 = vmatprep.subr.bf16.mxu0 %v828_v16  ;;  %v934_v25 = vpack.c.bf16 %v38_v22, %v34_v20  ;;  %v832_v26 = vpack.c.bf16 %v45_v24, %v41_v23  ;;  %v43_v27 = vld [vmem:[%s2003_s1 + $0x98] sm:$0xff]  ;;  %v40_v29 = vld [vmem:[%s2003_s1 + $0x80] sm:$0xff]  ;;  %v42_v32 = vld [vmem:[%s2003_s1 + $0x90] sm:$0xff] }
   0x8   :  { %933 = vmatprep.subr.bf16.mxu1 %v932_v17  ;;  %v47_v28 = vld [vmem:[%s2003_s1 + $0xb8] sm:$0xff]  ;;  %v44_v31 = vld [vmem:[%s2003_s1 + $0xa0] sm:$0xff]  ;;  %v46_v33 = vld [vmem:[%s2003_s1 + $0xb0] sm:$0xff] }
   0x9   :  { %v936_v30 = vpack.c.bf16 %v47_v28, %v43_v27  ;;  %v834_v34 = vpack.c.bf16 %v44_v31, %v40_v29  ;;  %v49_v35 = vld [vmem:[%s2003_s1 + $0xc8] sm:$0xff]  ;;  %v51_v37 = vld [vmem:[%s2003_s1 + $0xd8] sm:$0xff]  ;;  %v938_v38 = vpack.c.bf16 %v46_v33, %v42_v32  ;;  %v48_v41 = vld [vmem:[%s2003_s1 + $0xc0] sm:$0xff] }
   0xa   :  { %831 = vmatpush1.bf16.msra.mxu0 %v830_v21  ;;  %v53_v36 = vld [vmem:[%s2003_s1 + $0xe8] sm:$0xff]  ;;  %v55_v40 = vld [vmem:[%s2003_s1 + $0xf8] sm:$0xff]  ;;  %v52_v42 = vld [vmem:[%s2003_s1 + $0xe0] sm:$0xff] }
   0xb   :  { %935 = vmatpush1.bf16.msra.mxu1 %v934_v25  ;;  %833 = vmatprep.subr.bf16.mxu0 %v832_v26  ;;  %v836_v39 = vpack.c.bf16 %v53_v36, %v49_v35  ;;  %v940_v43 = vpack.c.bf16 %v55_v40, %v51_v37  ;;  %v50_v44 = vld [vmem:[%s2003_s1 + $0xd0] sm:$0xff]  ;;  %v57_v46 = vld [vmem:[%s2003_s1 + $0x108] sm:$0xff]  ;;  %v59_v48 = vld [vmem:[%s2003_s1 + $0x118] sm:$0xff]  ;;  %v838_v50 = vpack.c.bf16 %v52_v42, %v48_v41 }
   0xc   :  { %937 = vmatprep.subr.bf16.mxu1 %v936_v30  ;;  %v54_v45 = vld [vmem:[%s2003_s1 + $0xf0] sm:$0xff]  ;;  %v61_v47 = vld [vmem:[%s2003_s1 + $0x128] sm:$0xff]  ;;  %v63_v49 = vld [vmem:[%s2003_s1 + $0x138] sm:$0xff] }
   0xd   :  { %v942_v51 = vpack.c.bf16 %v54_v45, %v50_v44  ;;  %v840_v52 = vpack.c.bf16 %v61_v47, %v57_v46  ;;  %v56_v53 = vld [vmem:[%s2003_s1 + $0x100] sm:$0xff]  ;;  %v58_v55 = vld [vmem:[%s2003_s1 + $0x110] sm:$0xff]  ;;  %v944_v56 = vpack.c.bf16 %v63_v49, %v59_v48  ;;  %v65_v58 = vld [vmem:[%s2003_s1 + $0x148] sm:$0xff] }
   0xe   :  { %835 = vmatpush1.bf16.msra.mxu0 %v834_v34  ;;  %v60_v54 = vld [vmem:[%s2003_s1 + $0x120] sm:$0xff]  ;;  %v62_v57 = vld [vmem:[%s2003_s1 + $0x130] sm:$0xff]  ;;  %v69_v59 = vld [vmem:[%s2003_s1 + $0x168] sm:$0xff] }
   0xf   :  { %939 = vmatpush1.bf16.msra.mxu1 %v938_v38  ;;  %837 = vmatprep.subr.bf16.mxu0 %v836_v39  ;;  %v67_v60 = vld [vmem:[%s2003_s1 + $0x158] sm:$0xff]  ;;  %v842_v62 = vpack.c.bf16 %v60_v54, %v56_v53  ;;  %v946_v63 = vpack.c.bf16 %v62_v57, %v58_v55  ;;  %v844_v0 = vpack.c.bf16 %v69_v59, %v65_v58  ;;  %v64_v1 = vld [vmem:[%s2003_s1 + $0x140] sm:$0xff]  ;;  %v66_v3 = vld [vmem:[%s2003_s1 + $0x150] sm:$0xff] }
  0x10   :  { %941 = vmatprep.subr.bf16.mxu1 %v940_v43  ;;  %v71_v61 = vld [vmem:[%s2003_s1 + $0x178] sm:$0xff]  ;;  %v68_v2 = vld [vmem:[%s2003_s1 + $0x160] sm:$0xff]  ;;  %v70_v5 = vld [vmem:[%s2003_s1 + $0x170] sm:$0xff] }
  0x11   :  { %v948_v4 = vpack.c.bf16 %v71_v61, %v67_v60  ;;  %v73_v6 = vld [vmem:[%s2003_s1 + $0x188] sm:$0xff]  ;;  %v75_v8 = vld [vmem:[%s2003_s1 + $0x198] sm:$0xff]  ;;  %v846_v10 = vpack.c.bf16 %v68_v2, %v64_v1  ;;  %v950_v11 = vpack.c.bf16 %v70_v5, %v66_v3  ;;  %v72_v13 = vld [vmem:[%s2003_s1 + $0x180] sm:$0xff] }
  0x12   :  { %839 = vmatpush1.bf16.msra.mxu0 %v838_v50  ;;  %v77_v7 = vld [vmem:[%s2003_s1 + $0x1a8] sm:$0xff]  ;;  %v79_v9 = vld [vmem:[%s2003_s1 + $0x1b8] sm:$0xff]  ;;  %v76_v14 = vld [vmem:[%s2003_s1 + $0x1a0] sm:$0xff] }
  0x13   :  { %943 = vmatpush1.bf16.msra.mxu1 %v942_v51  ;;  %841 = vmatprep.subr.bf16.mxu0 %v840_v52  ;;  %v848_v12 = vpack.c.bf16 %v77_v7, %v73_v6  ;;  %v74_v15 = vld [vmem:[%s2003_s1 + $0x190] sm:$0xff]  ;;  %v952_v16 = vpack.c.bf16 %v79_v9, %v75_v8  ;;  %v81_v18 = vld [vmem:[%s2003_s1 + $0x1c8] sm:$0xff]  ;;  %v83_v20 = vld [vmem:[%s2003_s1 + $0x1d8] sm:$0xff]  ;;  %v850_v22 = vpack.c.bf16 %v76_v14, %v72_v13 }
  0x14   :  { %945 = vmatprep.subr.bf16.mxu1 %v944_v56  ;;  %v78_v17 = vld [vmem:[%s2003_s1 + $0x1b0] sm:$0xff]  ;;  %v85_v19 = vld [vmem:[%s2003_s1 + $0x1e8] sm:$0xff]  ;;  %v87_v21 = vld [vmem:[%s2003_s1 + $0x1f8] sm:$0xff] }
  0x15   :  { %v954_v23 = vpack.c.bf16 %v78_v17, %v74_v15  ;;  %v852_v24 = vpack.c.bf16 %v85_v19, %v81_v18  ;;  %v80_v25 = vld [vmem:[%s2003_s1 + $0x1c0] sm:$0xff]  ;;  %v82_v27 = vld [vmem:[%s2003_s1 + $0x1d0] sm:$0xff]  ;;  %v956_v28 = vpack.c.bf16 %v87_v21, %v83_v20  ;;  %v89_v30 = vld [vmem:[%s2003_s1 + $0x208] sm:$0xff] }
  0x16   :  { %843 = vmatpush1.bf16.msra.mxu0 %v842_v62  ;;  %v84_v26 = vld [vmem:[%s2003_s1 + $0x1e0] sm:$0xff]  ;;  %v86_v29 = vld [vmem:[%s2003_s1 + $0x1f0] sm:$0xff]  ;;  %v93_v31 = vld [vmem:[%s2003_s1 + $0x228] sm:$0xff] }
  0x17   :  { %947 = vmatpush1.bf16.msra.mxu1 %v946_v63  ;;  %845 = vmatprep.subr.bf16.mxu0 %v844_v0  ;;  %v91_v32 = vld [vmem:[%s2003_s1 + $0x218] sm:$0xff]  ;;  %v854_v34 = vpack.c.bf16 %v84_v26, %v80_v25  ;;  %v958_v35 = vpack.c.bf16 %v86_v29, %v82_v27  ;;  %v856_v36 = vpack.c.bf16 %v93_v31, %v89_v30  ;;  %v88_v37 = vld [vmem:[%s2003_s1 + $0x200] sm:$0xff]  ;;  %v90_v39 = vld [vmem:[%s2003_s1 + $0x210] sm:$0xff] }
  0x18   :  { %949 = vmatprep.subr.bf16.mxu1 %v948_v4  ;;  %v95_v33 = vld [vmem:[%s2003_s1 + $0x238] sm:$0xff]  ;;  %v92_v38 = vld [vmem:[%s2003_s1 + $0x220] sm:$0xff]  ;;  %v94_v41 = vld [vmem:[%s2003_s1 + $0x230] sm:$0xff] }
  0x19   :  { %v960_v40 = vpack.c.bf16 %v95_v33, %v91_v32  ;;  %v97_v42 = vld [vmem:[%s2003_s1 + $0x248] sm:$0xff]  ;;  %v99_v44 = vld [vmem:[%s2003_s1 + $0x258] sm:$0xff]  ;;  %v858_v46 = vpack.c.bf16 %v92_v38, %v88_v37  ;;  %v962_v47 = vpack.c.bf16 %v94_v41, %v90_v39  ;;  %v96_v49 = vld [vmem:[%s2003_s1 + $0x240] sm:$0xff] }
  0x1a   :  { %847 = vmatpush1.bf16.msra.mxu0 %v846_v10  ;;  %v101_v43 = vld [vmem:[%s2003_s1 + $0x268] sm:$0xff]  ;;  %v103_v45 = vld [vmem:[%s2003_s1 + $0x278] sm:$0xff]  ;;  %v100_v50 = vld [vmem:[%s2003_s1 + $0x260] sm:$0xff] }
  0x1b   :  { %951 = vmatpush1.bf16.msra.mxu1 %v950_v11  ;;  %849 = vmatprep.subr.bf16.mxu0 %v848_v12  ;;  %v860_v48 = vpack.c.bf16 %v101_v43, %v97_v42  ;;  %v98_v51 = vld [vmem:[%s2003_s1 + $0x250] sm:$0xff]  ;;  %v964_v52 = vpack.c.bf16 %v103_v45, %v99_v44  ;;  %v105_v54 = vld [vmem:[%s2003_s1 + $0x288] sm:$0xff]  ;;  %v107_v56 = vld [vmem:[%s2003_s1 + $0x298] sm:$0xff]  ;;  %v862_v58 = vpack.c.bf16 %v100_v50, %v96_v49 }
  0x1c   :  { %953 = vmatprep.subr.bf16.mxu1 %v952_v16  ;;  %v102_v53 = vld [vmem:[%s2003_s1 + $0x270] sm:$0xff]  ;;  %v109_v55 = vld [vmem:[%s2003_s1 + $0x2a8] sm:$0xff]  ;;  %v111_v57 = vld [vmem:[%s2003_s1 + $0x2b8] sm:$0xff] }
  0x1d   :  { %v966_v59 = vpack.c.bf16 %v102_v53, %v98_v51  ;;  %v864_v60 = vpack.c.bf16 %v109_v55, %v105_v54  ;;  %v104_v61 = vld [vmem:[%s2003_s1 + $0x280] sm:$0xff]  ;;  %v106_v63 = vld [vmem:[%s2003_s1 + $0x290] sm:$0xff]  ;;  %v968_v0 = vpack.c.bf16 %v111_v57, %v107_v56  ;;  %v113_v2 = vld [vmem:[%s2003_s1 + $0x2c8] sm:$0xff] }
  0x1e   :  { %851 = vmatpush1.bf16.msra.mxu0 %v850_v22  ;;  %v108_v62 = vld [vmem:[%s2003_s1 + $0x2a0] sm:$0xff]  ;;  %v110_v1 = vld [vmem:[%s2003_s1 + $0x2b0] sm:$0xff]  ;;  %v117_v3 = vld [vmem:[%s2003_s1 + $0x2e8] sm:$0xff] }
  0x1f   :  { %955 = vmatpush1.bf16.msra.mxu1 %v954_v23  ;;  %853 = vmatprep.subr.bf16.mxu0 %v852_v24  ;;  %v115_v4 = vld [vmem:[%s2003_s1 + $0x2d8] sm:$0xff]  ;;  %v866_v6 = vpack.c.bf16 %v108_v62, %v104_v61  ;;  %v112_v7 = vld [vmem:[%s2003_s1 + $0x2c0] sm:$0xff]  ;;  %v970_v8 = vpack.c.bf16 %v110_v1, %v106_v63  ;;  %v868_v9 = vpack.c.bf16 %v117_v3, %v113_v2  ;;  %v114_v11 = vld [vmem:[%s2003_s1 + $0x2d0] sm:$0xff] }
  0x20   :  { %957 = vmatprep.subr.bf16.mxu1 %v956_v28  ;;  %v119_v5 = vld [vmem:[%s2003_s1 + $0x2f8] sm:$0xff]  ;;  %v116_v10 = vld [vmem:[%s2003_s1 + $0x2e0] sm:$0xff]  ;;  %v118_v12 = vld [vmem:[%s2003_s1 + $0x2f0] sm:$0xff] }
  0x21   :  { %v972_v13 = vpack.c.bf16 %v119_v5, %v115_v4  ;;  %v121_v14 = vld [vmem:[%s2003_s1 + $0x308] sm:$0xff]  ;;  %v123_v17 = vld [vmem:[%s2003_s1 + $0x318] sm:$0xff]  ;;  %v870_v19 = vpack.c.bf16 %v116_v10, %v112_v7  ;;  %v974_v20 = vpack.c.bf16 %v118_v12, %v114_v11  ;;  %v120_v22 = vld [vmem:[%s2003_s1 + $0x300] sm:$0xff] }
  0x22   :  { %855 = vmatpush1.bf16.msra.mxu0 %v854_v34  ;;  %v125_v15 = vld [vmem:[%s2003_s1 + $0x328] sm:$0xff]  ;;  %v127_v18 = vld [vmem:[%s2003_s1 + $0x338] sm:$0xff]  ;;  %v124_v23 = vld [vmem:[%s2003_s1 + $0x320] sm:$0xff] }
  0x23   :  { %959 = vmatpush1.bf16.msra.mxu1 %v958_v35  ;;  %857 = vmatprep.subr.bf16.mxu0 %v856_v36  ;;  %v21_v16 = vld [vmem:[%s2004_s0 + $0x8] sm:$0xff]  ;;  %v872_v21 = vpack.c.bf16 %v125_v15, %v121_v14  ;;  %v122_v24 = vld [vmem:[%s2003_s1 + $0x310] sm:$0xff]  ;;  %v976_v25 = vpack.c.bf16 %v127_v18, %v123_v17  ;;  %v131_v29 = vld [vmem:[%s2003_s1 + $0x358] sm:$0xff]  ;;  %v874_v31 = vpack.c.bf16 %v124_v23, %v120_v22 }
  0x24   :  { %961 = vmatprep.subr.bf16.mxu1 %v960_v40  ;;  %339 = vmatprep.mubr.f32.mxu0 %v21_v16  ;;  %v126_v26 = vld [vmem:[%s2003_s1 + $0x330] sm:$0xff]  ;;  %v129_v27 = vld [vmem:[%s2003_s1 + $0x348] sm:$0xff]  ;;  %v135_v30 = vld [vmem:[%s2003_s1 + $0x378] sm:$0xff] }
  0x25   :  { %481 = vmatprep.mubr.f32.mxu1 %v21_v16  ;;  %v133_v28 = vld [vmem:[%s2003_s1 + $0x368] sm:$0xff]  ;;  %v978_v32 = vpack.c.bf16 %v126_v26, %v122_v24  ;;  %v128_v34 = vld [vmem:[%s2003_s1 + $0x340] sm:$0xff]  ;;  %v130_v36 = vld [vmem:[%s2003_s1 + $0x350] sm:$0xff]  ;;  %v980_v37 = vpack.c.bf16 %v135_v30, %v131_v29 }
  0x26   :  { %859 = vmatpush1.bf16.msra.mxu0 %v858_v46  ;;  %v876_v33 = vpack.c.bf16 %v133_v28, %v129_v27  ;;  %v132_v35 = vld [vmem:[%s2003_s1 + $0x360] sm:$0xff]  ;;  %v134_v38 = vld [vmem:[%s2003_s1 + $0x370] sm:$0xff]  ;;  %v137_v39 = vld [vmem:[%s2003_s1 + $0x388] sm:$0xff] }
  0x27   :  { %963 = vmatpush1.bf16.msra.mxu1 %v962_v47  ;;  %861 = vmatprep.subr.bf16.mxu0 %v860_v48  ;;  %v141_v40 = vld [vmem:[%s2003_s1 + $0x3a8] sm:$0xff]  ;;  %v139_v41 = vld [vmem:[%s2003_s1 + $0x398] sm:$0xff]  ;;  %v878_v43 = vpack.c.bf16 %v132_v35, %v128_v34  ;;  %v982_v44 = vpack.c.bf16 %v134_v38, %v130_v36  ;;  %v136_v46 = vld [vmem:[%s2003_s1 + $0x380] sm:$0xff] }
  0x28   :  { %965 = vmatprep.subr.bf16.mxu1 %v964_v52  ;;  %v143_v42 = vld [vmem:[%s2003_s1 + $0x3b8] sm:$0xff]  ;;  %v880_v45 = vpack.c.bf16 %v141_v40, %v137_v39  ;;  %v140_v47 = vld [vmem:[%s2003_s1 + $0x3a0] sm:$0xff]  ;;  %v138_v48 = vld [vmem:[%s2003_s1 + $0x390] sm:$0xff] }
  0x29   :  { %v984_v49 = vpack.c.bf16 %v143_v42, %v139_v41  ;;  %v142_v50 = vld [vmem:[%s2003_s1 + $0x3b0] sm:$0xff]  ;;  %v145_v51 = vld [vmem:[%s2003_s1 + $0x3c8] sm:$0xff]  ;;  %v147_v53 = vld [vmem:[%s2003_s1 + $0x3d8] sm:$0xff]  ;;  %v882_v55 = vpack.c.bf16 %v140_v47, %v136_v46 }
  0x2a   :  { %863 = vmatpush1.bf16.msra.mxu0 %v862_v58  ;;  %v149_v52 = vld [vmem:[%s2003_s1 + $0x3e8] sm:$0xff]  ;;  %v151_v54 = vld [vmem:[%s2003_s1 + $0x3f8] sm:$0xff]  ;;  %v986_v56 = vpack.c.bf16 %v142_v50, %v138_v48  ;;  %v144_v58 = vld [vmem:[%s2003_s1 + $0x3c0] sm:$0xff] }
  0x2b   :  { %967 = vmatpush1.bf16.msra.mxu1 %v966_v59  ;;  %865 = vmatprep.subr.bf16.mxu0 %v864_v60  ;;  %v884_v57 = vpack.c.bf16 %v149_v52, %v145_v51  ;;  %v148_v59 = vld [vmem:[%s2003_s1 + $0x3e0] sm:$0xff]  ;;  %v146_v60 = vld [vmem:[%s2003_s1 + $0x3d0] sm:$0xff]  ;;  %v988_v61 = vpack.c.bf16 %v151_v54, %v147_v53  ;;  %v153_v63 = vld [vmem:[%s2003_s1 + $0x408] sm:$0xff] }
  0x2c   :  { %969 = vmatprep.subr.bf16.mxu1 %v968_v0  ;;  %v150_v62 = vld [vmem:[%s2003_s1 + $0x3f0] sm:$0xff]  ;;  %v157_v0 = vld [vmem:[%s2003_s1 + $0x428] sm:$0xff]  ;;  %v155_v1 = vld [vmem:[%s2003_s1 + $0x418] sm:$0xff]  ;;  %v886_v3 = vpack.c.bf16 %v148_v59, %v144_v58 }
  0x2d   :  { %v159_v2 = vld [vmem:[%s2003_s1 + $0x438] sm:$0xff]  ;;  %v990_v4 = vpack.c.bf16 %v150_v62, %v146_v60  ;;  %v888_v5 = vpack.c.bf16 %v157_v0, %v153_v63  ;;  %v156_v7 = vld [vmem:[%s2003_s1 + $0x420] sm:$0xff]  ;;  %v158_v10 = vld [vmem:[%s2003_s1 + $0x430] sm:$0xff] }
  0x2e   :  { %867 = vmatpush1.bf16.msra.mxu0 %v866_v6  ;;  %v152_v6 = vld [vmem:[%s2003_s1 + $0x400] sm:$0xff]  ;;  %v161_v11 = vld [vmem:[%s2003_s1 + $0x448] sm:$0xff]  ;;  %v167_v14 = vld [vmem:[%s2003_s1 + $0x478] sm:$0xff] }
  0x2f   :  { %971 = vmatpush1.bf16.msra.mxu1 %v970_v8  ;;  %869 = vmatprep.subr.bf16.mxu0 %v868_v9  ;;  %v154_v8 = vld [vmem:[%s2003_s1 + $0x410] sm:$0xff]  ;;  %v992_v9 = vpack.c.bf16 %v159_v2, %v155_v1  ;;  %v165_v12 = vld [vmem:[%s2003_s1 + $0x468] sm:$0xff]  ;;  %v20_v15 = vld [vmem:[%s2004_s0] sm:$0xff]  ;;  %v890_v16 = vpack.c.bf16 %v156_v7, %v152_v6 }
  0x30   :  { %973 = vmatprep.subr.bf16.mxu1 %v972_v13  ;;  %v163_v13 = vld [vmem:[%s2003_s1 + $0x458] sm:$0xff]  ;;  %v994_v17 = vpack.c.bf16 %v158_v10, %v154_v8  ;;  %v892_v18 = vpack.c.bf16 %v165_v12, %v161_v11  ;;  %v166_v23 = vld [vmem:[%s2003_s1 + $0x470] sm:$0xff]  ;;  %v169_v24 = vld [vmem:[%s2003_s1 + $0x488] sm:$0xff] }
  0x31   :  { %v996_v22 = vpack.c.bf16 %v167_v14, %v163_v13  ;;  %v171_v26 = vld [vmem:[%s2003_s1 + $0x498] sm:$0xff]  ;;  %v174_v35 = vld [vmem:[%s2003_s1 + $0x4b0] sm:$0xff]  ;;  %v177_v36 = vld [vmem:[%s2003_s1 + $0x4c8] sm:$0xff] }
  0x32   :  { %871 = vmatpush1.bf16.msra.mxu0 %v870_v19  ;;  %v160_v19 = vld [vmem:[%s2003_s1 + $0x440] sm:$0xff]  ;;  %v175_v27 = vld [vmem:[%s2003_s1 + $0x4b8] sm:$0xff]  ;;  %v178_v46 = vld [vmem:[%s2003_s1 + $0x4d0] sm:$0xff] }
  0x33   :  { %975 = vmatpush1.bf16.msra.mxu1 %v974_v20  ;;  %873 = vmatprep.subr.bf16.mxu0 %v872_v21  ;;  %v164_v20 = vld [vmem:[%s2003_s1 + $0x460] sm:$0xff]  ;;  %v162_v21 = vld [vmem:[%s2003_s1 + $0x450] sm:$0xff]  ;;  %v1000_v34 = vpack.c.bf16 %v175_v27, %v171_v26  ;;  %v179_v38 = vld [vmem:[%s2003_s1 + $0x4d8] sm:$0xff] }
  0x34   :  { %977 = vmatprep.subr.bf16.mxu1 %v976_v25  ;;  %v173_v25 = vld [vmem:[%s2003_s1 + $0x4a8] sm:$0xff]  ;;  %v894_v28 = vpack.c.bf16 %v164_v20, %v160_v19  ;;  %v998_v29 = vpack.c.bf16 %v166_v23, %v162_v21  ;;  %v183_v39 = vld [vmem:[%s2003_s1 + $0x4f8] sm:$0xff]  ;;  %v182_v48 = vld [vmem:[%s2003_s1 + $0x4f0] sm:$0xff] }
  0x35   :  { %v896_v30 = vpack.c.bf16 %v173_v25, %v169_v24  ;;  %v23_v40 = vld [vmem:[%s2004_s0 + $0x18] sm:$0xff]  ;;  %v1004_v47 = vpack.c.bf16 %v183_v39, %v179_v38  ;;  %v189_v50 = vld [vmem:[%s2003_s1 + $0x528] sm:$0xff]  ;;  %v1006_v54 = vpack.c.bf16 %v182_v48, %v178_v46  ;;  %v186_v58 = vld [vmem:[%s2003_s1 + $0x510] sm:$0xff] }
  0x36   :  { %875 = vmatpush1.bf16.msra.mxu0 %v874_v31  ;;  %v168_v31 = vld [vmem:[%s2003_s1 + $0x480] sm:$0xff]  ;;  %v187_v51 = vld [vmem:[%s2003_s1 + $0x518] sm:$0xff]  ;;  %v190_v60 = vld [vmem:[%s2003_s1 + $0x530] sm:$0xff] }
  0x37   :  { %979 = vmatpush1.bf16.msra.mxu1 %v978_v32  ;;  %877 = vmatprep.subr.bf16.mxu0 %v876_v33  ;;  %v172_v32 = vld [vmem:[%s2003_s1 + $0x4a0] sm:$0xff]  ;;  %v170_v33 = vld [vmem:[%s2003_s1 + $0x490] sm:$0xff]  ;;  %v191_v52 = vld [vmem:[%s2003_s1 + $0x538] sm:$0xff]  ;;  %v1010_v2 = vpack.c.bf16 %v190_v60, %v186_v58 }
  0x38   :  { %981 = vmatprep.subr.bf16.mxu1 %v980_v37  ;;  %v181_v37 = vld [vmem:[%s2003_s1 + $0x4e8] sm:$0xff]  ;;  %v898_v41 = vpack.c.bf16 %v172_v32, %v168_v31  ;;  %v1002_v42 = vpack.c.bf16 %v174_v35, %v170_v33  ;;  %v1008_v59 = vpack.c.bf16 %v191_v52, %v187_v51  ;;  %v195_v63 = vld [vmem:[%s2003_s1 + $0x558] sm:$0xff]  ;;  %v194_v6 = vld [vmem:[%s2003_s1 + $0x550] sm:$0xff] }
  0x39   :  { %v197_v62 = vld [vmem:[%s2003_s1 + $0x568] sm:$0xff]  ;;  %v199_v0 = vld [vmem:[%s2003_s1 + $0x578] sm:$0xff]  ;;  %v198_v8 = vld [vmem:[%s2003_s1 + $0x570] sm:$0xff] }
  0x3a   :  { %879 = vmatpush1.bf16.msra.mxu0 %v878_v43  ;;  %v900_v43 = vpack.c.bf16 %v181_v37, %v177_v36  ;;  %v1012_v7 = vpack.c.bf16 %v199_v0, %v195_v63  ;;  %v205_v10 = vld [vmem:[%s2003_s1 + $0x5a8] sm:$0xff]  ;;  %v203_v11 = vld [vmem:[%s2003_s1 + $0x598] sm:$0xff]  ;;  %v1014_v14 = vpack.c.bf16 %v198_v8, %v194_v6  ;;  %v206_v20 = vld [vmem:[%s2003_s1 + $0x5b0] sm:$0xff] }
  0x3b   :  { %983 = vmatpush1.bf16.msra.mxu1 %v982_v44  ;;  %881 = vmatprep.subr.bf16.mxu0 %v880_v45  ;;  %v176_v44 = vld [vmem:[%s2003_s1 + $0x4c0] sm:$0xff]  ;;  %v207_v12 = vld [vmem:[%s2003_s1 + $0x5b8] sm:$0xff]  ;;  %v209_v21 = vld [vmem:[%s2003_s1 + $0x5c8] sm:$0xff] }
  0x3c   :  { %985 = vmatprep.subr.bf16.mxu1 %v984_v49  ;;  %v180_v45 = vld [vmem:[%s2003_s1 + $0x4e0] sm:$0xff]  ;;  %v185_v49 = vld [vmem:[%s2003_s1 + $0x508] sm:$0xff]  ;;  %v1016_v19 = vpack.c.bf16 %v207_v12, %v203_v11  ;;  %v211_v23 = vld [vmem:[%s2003_s1 + $0x5d8] sm:$0xff] }
  0x3d   :  { %v902_v53 = vpack.c.bf16 %v180_v45, %v176_v44  ;;  %v215_v24 = vld [vmem:[%s2003_s1 + $0x5f8] sm:$0xff]  ;;  %v214_v32 = vld [vmem:[%s2003_s1 + $0x5f0] sm:$0xff]  ;;  %v217_v33 = vld [vmem:[%s2003_s1 + $0x608] sm:$0xff] }
  0x3e   :  { %883 = vmatpush1.bf16.msra.mxu0 %v882_v55  ;;  %v904_v55 = vpack.c.bf16 %v189_v50, %v185_v49  ;;  %v1020_v31 = vpack.c.bf16 %v215_v24, %v211_v23  ;;  %v219_v35 = vld [vmem:[%s2003_s1 + $0x618] sm:$0xff]  ;;  %v222_v44 = vld [vmem:[%s2003_s1 + $0x630] sm:$0xff]  ;;  %v225_v45 = vld [vmem:[%s2003_s1 + $0x648] sm:$0xff] }
  0x3f   :  { %987 = vmatpush1.bf16.msra.mxu1 %v986_v56  ;;  %885 = vmatprep.subr.bf16.mxu0 %v884_v57  ;;  %v184_v56 = vld [vmem:[%s2003_s1 + $0x500] sm:$0xff]  ;;  %v223_v36 = vld [vmem:[%s2003_s1 + $0x638] sm:$0xff]  ;;  %v229_v46 = vld [vmem:[%s2003_s1 + $0x668] sm:$0xff] }
  0x40   :  { %989 = vmatprep.subr.bf16.mxu1 %v988_v61  ;;  %v188_v57 = vld [vmem:[%s2003_s1 + $0x520] sm:$0xff]  ;;  %v193_v61 = vld [vmem:[%s2003_s1 + $0x548] sm:$0xff]  ;;  %v231_v48 = vld [vmem:[%s2003_s1 + $0x678] sm:$0xff]  ;;  %v924_v51 = vpack.c.bf16 %v229_v46, %v225_v45 }
  0x41   :  { %v906_v1 = vpack.c.bf16 %v188_v57, %v184_v56  ;;  %v224_v52 = vld [vmem:[%s2003_s1 + $0x640] sm:$0xff]  ;;  %v230_v56 = vld [vmem:[%s2003_s1 + $0x670] sm:$0xff]  ;;  %v235_v60 = vld [vmem:[%s2003_s1 + $0x698] sm:$0xf] }
  0x42   :  { %887 = vmatpush1.bf16.msra.mxu0 %v886_v3  ;;  %v908_v3 = vpack.c.bf16 %v197_v62, %v193_v61  ;;  %v232_v61 = vld [vmem:[%s2003_s1 + $0x680] sm:$0xf]  ;;  %v596_v63 = vld [vmem:[%s2005_s3 + $0x108] sm:$0xff]  ;;  %v581_v6 = vld [vmem:[%s2005_s3 + $0x90] sm:$0xff] }
  0x43   :  { %991 = vmatpush1.bf16.msra.mxu1 %v990_v4  ;;  %889 = vmatprep.subr.bf16.mxu0 %v888_v5  ;;  %v192_v4 = vld [vmem:[%s2003_s1 + $0x540] sm:$0xff]  ;;  %v598_v11 = vld [vmem:[%s2005_s3 + $0x118] sm:$0xff] }
  0x44   :  { %993 = vmatprep.subr.bf16.mxu1 %v992_v9  ;;  %v196_v5 = vld [vmem:[%s2003_s1 + $0x560] sm:$0xff]  ;;  %v201_v9 = vld [vmem:[%s2003_s1 + $0x588] sm:$0xff]  ;;  %v590_v45 = vld [vmem:[%s2005_s3 + $0xd8] sm:$0xff] }
  0x45   :  { %340 = vmatmul.mubr.f32.vlgmr.msra.gmra.mrb[0].mxu0 %v20_v15  ;;  %v910_v13 = vpack.c.bf16 %v196_v5, %v192_v4  ;;  %v595_v62 = vld [vmem:[%s2005_s3 + $0x100] sm:$0xff]  ;;  %v564_v4 = vld [vmem:[%s2005_s3 + $0x8] sm:$0xff]  ;;  %v22_v5 = vld [vmem:[%s2004_s0 + $0x10] sm:$0xff] }
  0x46   :  { %891 = vmatpush1.bf16.msra.mxu0 %v890_v16  ;;  %482 = vmatmul.mubr.f32.vlgmr.msra.gmra.mrb[0].mxu1 %v20_v15  ;;  %v912_v15 = vpack.c.bf16 %v205_v10, %v201_v9  ;;  %v200_v16 = vld [vmem:[%s2003_s1 + $0x580] sm:$0xff]  ;;  %v1065_v8 = vpack.c.bf16 %v596_v63, %v595_v62  ;;  %v597_v10 = vld [vmem:[%s2005_s3 + $0x110] sm:$0xff]  ;;  %v610_v62 = vld [vmem:[%s2005_s3 + $0x178] sm:$0xff] }
  0x47   :  { %995 = vmatpush1.bf16.msra.mxu1 %v994_v17  ;;  %893 = vmatprep.subr.bf16.mxu0 %v892_v18  ;;  %v204_v17 = vld [vmem:[%s2003_s1 + $0x5a0] sm:$0xff]  ;;  %v202_v18 = vld [vmem:[%s2003_s1 + $0x590] sm:$0xff] }
  0x48   :  { %997 = vmatprep.subr.bf16.mxu1 %v996_v22  ;;  %783 = vmatprep.mubr.msk.f32.mxu0 %vm258_vm0, %v23_v40  ;;  %v213_v22 = vld [vmem:[%s2003_s1 + $0x5e8] sm:$0xff]  ;;  %v914_v25 = vpack.c.bf16 %v204_v17, %v200_v16  ;;  %v1018_v26 = vpack.c.bf16 %v206_v20, %v202_v18  ;;  %v579_v0 = vld [vmem:[%s2005_s3 + $0x80] sm:$0xff]  ;;  %v1115_v16 = vmov 0.0|0.0  }
  0x49   :  { %786 = vmatprep.mubr.msk.f32.mxu1 %vm258_vm0, %v23_v40  ;;  %v916_v27 = vpack.c.bf16 %v213_v22, %v209_v21  ;;  %v216_v40 = vld [vmem:[%s2003_s1 + $0x600] sm:$0xff]  ;;  %v584_v18 = vld [vmem:[%s2005_s3 + $0xa8] sm:$0xff] }
  0x4a   :  { %895 = vmatpush1.bf16.msra.mxu0 %v894_v28  ;;  %v208_v28 = vld [vmem:[%s2003_s1 + $0x5c0] sm:$0xff]  ;;  %v600_v21 = vld [vmem:[%s2005_s3 + $0x128] sm:$0xff] }
  0x4b   :  { %999 = vmatpush1.bf16.msra.mxu1 %v998_v29  ;;  %897 = vmatprep.subr.bf16.mxu0 %v896_v30  ;;  %v212_v29 = vld [vmem:[%s2003_s1 + $0x5e0] sm:$0xff]  ;;  %v210_v30 = vld [vmem:[%s2003_s1 + $0x5d0] sm:$0xff] }
  0x4c   :  { %1001 = vmatprep.subr.bf16.mxu1 %v1000_v34  ;;  %v221_v34 = vld [vmem:[%s2003_s1 + $0x628] sm:$0xff]  ;;  %v918_v37 = vpack.c.bf16 %v212_v29, %v208_v28  ;;  %v1022_v38 = vpack.c.bf16 %v214_v32, %v210_v30  ;;  %v583_v17 = vld [vmem:[%s2005_s3 + $0xa0] sm:$0xff]  ;;  %v601_v29 = vld [vmem:[%s2005_s3 + $0x130] sm:$0xff] }
  0x4d   :  { %v920_v39 = vpack.c.bf16 %v221_v34, %v217_v33  ;;  %v599_v20 = vld [vmem:[%s2005_s3 + $0x120] sm:$0xff]  ;;  %v1040_v23 = vpack.c.bf16 %v584_v18, %v583_v17  ;;  %v602_v30 = vld [vmem:[%s2005_s3 + $0x138] sm:$0xff]  ;;  %v569_v33 = vld [vmem:[%s2005_s3 + $0x30] sm:$0xff] }
  0x4e   :  { %899 = vmatpush1.bf16.msra.mxu0 %v898_v41  ;;  %v220_v41 = vld [vmem:[%s2003_s1 + $0x620] sm:$0xff]  ;;  %v1071_v28 = vpack.c.bf16 %v600_v21, %v599_v20  ;;  %v570_v34 = vld [vmem:[%s2005_s3 + $0x38] sm:$0xff]  ;;  %v620_v17 = vld [vmem:[%s2005_s3 + $0x1c8] sm:$0xff] }
  0x4f   :  { %1003 = vmatpush1.bf16.msra.mxu1 %v1002_v42  ;;  %901 = vmatprep.subr.bf16.mxu0 %v900_v43  ;;  %v218_v42 = vld [vmem:[%s2003_s1 + $0x610] sm:$0xff]  ;;  %v1024_v43 = vpack.c.bf16 %v223_v36, %v219_v35  ;;  %v922_v49 = vpack.c.bf16 %v220_v41, %v216_v40  ;;  %v567_v24 = vld [vmem:[%s2005_s3 + $0x20] sm:$0xff]  ;;  %v588_v36 = vld [vmem:[%s2005_s3 + $0xc8] sm:$0xff]  ;;  %v1046_v40 = vpack.c.bf16 %v570_v34, %v569_v33 }
  0x50   :  { %1005 = vmatprep.subr.bf16.mxu1 %v1004_v47  ;;  %v227_v47 = vld [vmem:[%s2003_s1 + $0x658] sm:$0xff]  ;;  %v1026_v50 = vpack.c.bf16 %v222_v44, %v218_v42  ;;  %v587_v35 = vld [vmem:[%s2005_s3 + $0xc0] sm:$0xff]  ;;  %v589_v44 = vld [vmem:[%s2005_s3 + $0xd0] sm:$0xff] }
  0x51   :  { %v1048_v41 = vpack.c.bf16 %v588_v36, %v587_v35  ;;  %v571_v42 = vld [vmem:[%s2005_s3 + $0x40] sm:$0xff]  ;;  %v594_v20 = vld [vmem:[%s2005_s3 + $0xf8] sm:$0xff] }
  0x52   :  { %903 = vmatpush1.bf16.msra.mxu0 %v902_v53  ;;  %v228_v53 = vld [vmem:[%s2003_s1 + $0x660] sm:$0xff] }
  0x53   :  { %1007 = vmatpush1.bf16.msra.mxu1 %v1006_v54  ;;  %905 = vmatprep.subr.bf16.mxu0 %v904_v55  ;;  %v1028_v54 = vpack.c.bf16 %v231_v48, %v227_v47  ;;  %v226_v55 = vld [vmem:[%s2003_s1 + $0x650] sm:$0xff]  ;;  %v926_v57 = vpack.c.bf16 %v228_v53, %v224_v52  ;;  %v606_v48 = vld [vmem:[%s2005_s3 + $0x158] sm:$0xff]  ;;  %v591_v53 = vld [vmem:[%s2005_s3 + $0xe0] sm:$0xff] }
  0x54   :  { %1009 = vmatprep.subr.bf16.mxu1 %v1008_v59  ;;  %v1030_v58 = vpack.c.bf16 %v230_v56, %v226_v55  ;;  %v233_v59 = vld [vmem:[%s2003_s1 + $0x688] sm:$0xf]  ;;  %v605_v47 = vld [vmem:[%s2005_s3 + $0x150] sm:$0xff]  ;;  %v574_v52 = vld [vmem:[%s2005_s3 + $0x58] sm:$0xff] }
  0x55   :  { %v1080_v55 = vpack.c.bf16 %v606_v48, %v605_v47  ;;  %v607_v56 = vld [vmem:[%s2005_s3 + $0x160] sm:$0xff] }
  0x56   :  { %907 = vmatpush1.bf16.msra.mxu0 %v906_v1  ;;  %v580_v1 = vld [vmem:[%s2005_s3 + $0x88] sm:$0xff] }
  0x57   :  { %1011 = vmatpush1.bf16.msra.mxu1 %v1010_v2  ;;  %909 = vmatprep.subr.bf16.mxu0 %v908_v3  ;;  %v234_v2 = vld [vmem:[%s2003_s1 + $0x690] sm:$0xf]  ;;  %v563_v3 = vld [vmem:[%s2005_s3] sm:$0xff]  ;;  %v1032_v9 = vpack.c.bf16 %v580_v1, %v579_v0  ;;  %v612_v1 = vld [vmem:[%s2005_s3 + $0x188] sm:$0xff] }
  0x58   :  { %1013 = vmatprep.subr.bf16.mxu1 %v1012_v7  ;;  %v582_v7 = vld [vmem:[%s2005_s3 + $0x98] sm:$0xff]  ;;  %v1034_v12 = vpack.c.bf16 %v564_v4, %v563_v3  ;;  %v611_v0 = vld [vmem:[%s2005_s3 + $0x180] sm:$0xff]  ;;  %v613_v3 = vld [vmem:[%s2005_s3 + $0x190] sm:$0xff] }
  0x59   :  { %v614_v4 = vld [vmem:[%s2005_s3 + $0x198] sm:$0xff] }
  0x5a   :  { %911 = vmatpush1.bf16.msra.mxu0 %v910_v13  ;;  %v1036_v13 = vpack.c.bf16 %v582_v7, %v581_v6  ;;  %v615_v6 = vld [vmem:[%s2005_s3 + $0x1a0] sm:$0xff]  ;;  %v616_v7 = vld [vmem:[%s2005_s3 + $0x1a8] sm:$0xff] }
  0x5b   :  { %1015 = vmatpush1.bf16.msra.mxu1 %v1014_v14  ;;  %913 = vmatprep.subr.bf16.mxu0 %v912_v15  ;;  %v565_v14 = vld [vmem:[%s2005_s3 + $0x10] sm:$0xff]  ;;  %v566_v15 = vld [vmem:[%s2005_s3 + $0x18] sm:$0xff] }
  0x5c   :  { %1017 = vmatprep.subr.bf16.mxu1 %v1016_v19  ;;  %v1068_v19 = vpack.c.bf16 %v598_v11, %v597_v10  ;;  %v1038_v22 = vpack.c.bf16 %v566_v15, %v565_v14  ;;  %v618_v10 = vld [vmem:[%s2005_s3 + $0x1b8] sm:$0xff]  ;;  %v619_v14 = vld [vmem:[%s2005_s3 + $0x1c0] sm:$0xff] }
  0x5d   :  { %v1101_v18 = vpack.c.bf16 %v620_v17, %v619_v14 }
  0x5e   :  { %915 = vmatpush1.bf16.msra.mxu0 %v914_v25  ;;  %v568_v25 = vld [vmem:[%s2005_s3 + $0x28] sm:$0xff] }
  0x5f   :  { %1019 = vmatpush1.bf16.msra.mxu1 %v1018_v26  ;;  %917 = vmatprep.subr.bf16.mxu0 %v916_v27  ;;  %v585_v26 = vld [vmem:[%s2005_s3 + $0xb0] sm:$0xff]  ;;  %v586_v27 = vld [vmem:[%s2005_s3 + $0xb8] sm:$0xff] }
  0x60   :  { %1021 = vmatprep.subr.bf16.mxu1 %v1020_v31  ;;  %v1042_v31 = vpack.c.bf16 %v568_v25, %v567_v24  ;;  %v1044_v32 = vpack.c.bf16 %v586_v27, %v585_v26  ;;  %v621_v24 = vld [vmem:[%s2005_s3 + $0x1d0] sm:$0xff]  ;;  %v622_v26 = vld [vmem:[%s2005_s3 + $0x1d8] sm:$0xff] }
  0x61   :  { %v1104_v27 = vpack.c.bf16 %v622_v26, %v621_v24 }
  0x62   :  { %919 = vmatpush1.bf16.msra.mxu0 %v918_v37  ;;  %v1074_v37 = vpack.c.bf16 %v602_v30, %v601_v29 }
  0x63   :  { %1023 = vmatpush1.bf16.msra.mxu1 %v1022_v38  ;;  %921 = vmatprep.subr.bf16.mxu0 %v920_v39  ;;  %v603_v38 = vld [vmem:[%s2005_s3 + $0x140] sm:$0xff]  ;;  %v604_v39 = vld [vmem:[%s2005_s3 + $0x148] sm:$0xff] }
  0x64   :  { %1025 = vmatprep.subr.bf16.mxu1 %v1024_v43  ;;  %v572_v43 = vld [vmem:[%s2005_s3 + $0x48] sm:$0xff]  ;;  %v1077_v46 = vpack.c.bf16 %v604_v39, %v603_v38 }
  0x66   :  { %923 = vmatpush1.bf16.msra.mxu0 %v922_v49  ;;  %v1050_v49 = vpack.c.bf16 %v572_v43, %v571_v42 }
  0x67   :  { %1027 = vmatpush1.bf16.msra.mxu1 %v1026_v50  ;;  %925 = vmatprep.subr.bf16.mxu0 %v924_v51  ;;  %v1052_v50 = vpack.c.bf16 %v590_v45, %v589_v44  ;;  %v573_v51 = vld [vmem:[%s2005_s3 + $0x50] sm:$0xff] }
  0x68   :  { %1029 = vmatprep.subr.bf16.mxu1 %v1028_v54  ;;  %v592_v54 = vld [vmem:[%s2005_s3 + $0xe8] sm:$0xff] }
  0x6a   :  { %927 = vmatpush1.bf16.msra.mxu0 %v926_v57  ;;  %v608_v57 = vld [vmem:[%s2005_s3 + $0x168] sm:$0xff] }
  0x6b   :  { %1031 = vmatpush1.bf16.msra.mxu1 %v1030_v58  ;;  %781 = vmatprep.subr.msk.mxu0 %vm262_vm1, %v233_v59  ;;  %v1054_v58 = vpack.c.bf16 %v574_v52, %v573_v51  ;;  %v1056_v59 = vpack.c.bf16 %v592_v54, %v591_v53  ;;  %v787_v52 = vld [vmem:[%s2007_s4] ss:$0 sm:$0xff] }
  0x6c   :  { %784 = vmatprep.subr.msk.mxu1 %vm262_vm1, %v235_v60  ;;  %v1083_v60 = vpack.c.bf16 %v608_v57, %v607_v56 }
  0x6e   :  { %782 = vmatpush1.msk.msra.mxu0 %vm262_vm1, %v232_v61  ;;  %v609_v61 = vld [vmem:[%s2005_s3 + $0x170] sm:$0xff] }
  0x6f   :  { %785 = vmatpush1.msk.msra.mxu1 %vm262_vm1, %v234_v2  ;;  %411 = vmatmul.mubr.f32.vlgmr.msra.gmra.mrb[0].mxu0 %v22_v5  ;;  %v1086_v63 = vpack.c.bf16 %v610_v62, %v609_v61  ;;  %v1089_v2 = vpack.c.bf16 %v612_v1, %v611_v0 }
  0x70   :  { %553 = vmatmul.mubr.f32.vlgmr.msra.gmra.mrb[0].mxu1 %v22_v5  ;;  %1064 = vmatprep.subr.bf16.mxu1 %v1115_v16  ;;  %v1092_v5 = vpack.c.bf16 %v614_v4, %v613_v3 }
  0x71   :  { %1066 = vmatpush1.bf16.msra.mxu1 %v1065_v8  ;;  %1033 = vmatprep.subr.bf16.mxu0 %v1032_v9  ;;  %v1095_v8 = vpack.c.bf16 %v616_v7, %v615_v6  ;;  %v617_v9 = vld [vmem:[%s2005_s3 + $0x1b0] sm:$0xff] }
  0x72   :  { %1067 = vmatprep.subr.bf16.mxu1 %v1115_v16  ;;  %1035 = vmatpush3.bf16.msra.mxu0 %v1034_v12  ;;  %v1098_v11 = vpack.c.bf16 %v618_v10, %v617_v9  ;;  %v575_v12 = vld [vmem:[%s2005_s3 + $0x60] sm:$0xff] }
  0x73   :  { %1037 = vmatprep.subr.bf16.mxu0 %v1036_v13  ;;  %v576_v13 = vld [vmem:[%s2005_s3 + $0x68] sm:$0xff] }
  0x74   :  { %v1058_v15 = vpack.c.bf16 %v576_v13, %v575_v12 }
  0x75   :  { %1069 = vmatpush1.bf16.msra.mxu1 %v1068_v19  ;;  %v593_v19 = vld [vmem:[%s2005_s3 + $0xf0] sm:$0xff] }
  0x76   :  { %1070 = vmatprep.subr.bf16.mxu1 %v1115_v16  ;;  %1039 = vmatpush3.bf16.msra.mxu0 %v1038_v22  ;;  %v1060_v21 = vpack.c.bf16 %v594_v20, %v593_v19  ;;  %v577_v22 = vld [vmem:[%s2005_s3 + $0x70] sm:$0xff] }
  0x77   :  { %1041 = vmatprep.subr.bf16.mxu0 %v1040_v23  ;;  %v578_v23 = vld [vmem:[%s2005_s3 + $0x78] sm:$0xff] }
  0x78   :  { %v1062_v25 = vpack.c.bf16 %v578_v23, %v577_v22 }
  0x79   :  { %1072 = vmatpush1.bf16.msra.mxu1 %v1071_v28  ;;  %v238_v28 = vlaneseq }
  0x7a   :  { %1073 = vmatprep.subr.bf16.mxu1 %v1115_v16  ;;  %1043 = vmatpush3.bf16.msra.mxu0 %v1042_v31  ;;  %v236_v31 = vld [vmem:[%s2006_s2] sm:$0xf] }
  0x7b   :  { %1045 = vmatprep.subr.bf16.mxu0 %v1044_v32  ;;  %v239_v29 = vshrl.u32 %v238_v28, 7 }
  0x7d   :  { %1075 = vmatpush1.bf16.msra.mxu1 %v1074_v37  ;;  %v240_v30 = vsub.s32 0, %v239_v29  ;;  %v248_v32 = vsub.s32 2, %v239_v29  ;;  %v244_v33 = vsub.s32 1, %v239_v29  ;;  %v252_v34 = vsub.s32 3, %v239_v29 }
  0x7e   :  { %1076 = vmatprep.subr.bf16.mxu1 %v1115_v16  ;;  %1047 = vmatpush3.bf16.msra.mxu0 %v1046_v40 }
  0x7f   :  { %1049 = vmatprep.subr.bf16.mxu0 %v1048_v41  ;;  %v249_v35 = vrot.slane %v236_v31, %v248_v32  ;;  %v245_v36 = vrot.slane %v236_v31, %v244_v33  ;;  %v253_v37 = vrot.slane %v236_v31, %v252_v34 }
  0x81   :  { %1078 = vmatpush1.bf16.msra.mxu1 %v1077_v46 }
  0x82   :  { %1079 = vmatprep.subr.bf16.mxu1 %v1115_v16  ;;  %1051 = vmatpush3.bf16.msra.mxu0 %v1050_v49 }
  0x83   :  { %1053 = vmatprep.subr.bf16.mxu0 %v1052_v50 }
  0x85   :  { %1081 = vmatpush1.bf16.msra.mxu1 %v1080_v55 }
  0x86   :  { %1082 = vmatprep.subr.bf16.mxu1 %v1115_v16  ;;  %1055 = vmatpush3.bf16.msra.mxu0 %v1054_v58 }
  0x87   :  { %1057 = vmatprep.subr.bf16.mxu0 %v1056_v59 }
  0x89   :  { %1084 = vmatpush1.bf16.msra.mxu1 %v1083_v60 }
  0x8a   :  { %1085 = vmatprep.subr.bf16.mxu1 %v1115_v16  ;;  %1059 = vmatpush3.bf16.msra.mxu0 %v1058_v15 }
  0x8b   :  { %1061 = vmatprep.subr.bf16.mxu0 %v1060_v21 }
  0x8d   :  { %1087 = vmatpush1.bf16.msra.mxu1 %v1086_v63 }
  0x8e   :  { %1088 = vmatprep.subr.bf16.mxu1 %v1115_v16  ;;  %1063 = vmatpush3.bf16.msra.mxu0 %v1062_v25 }
  0x91   :  { %1090 = vmatpush1.bf16.msra.mxu1 %v1089_v2 }
  0x92   :  { %1091 = vmatprep.subr.bf16.mxu1 %v1115_v16 }
  0x95   :  { %1093 = vmatpush1.bf16.msra.mxu1 %v1092_v5 }
  0x96   :  { %1094 = vmatprep.subr.bf16.mxu1 %v1115_v16 }
  0x99   :  { %1096 = vmatpush1.bf16.msra.mxu1 %v1095_v8 }
  0x9a   :  { %1097 = vmatprep.subr.bf16.mxu1 %v1115_v16 }
  0x9d   :  { %1099 = vmatpush1.bf16.msra.mxu1 %v1098_v11 }
  0x9e   :  { %1100 = vmatprep.subr.bf16.mxu1 %v1115_v16 }
  0xa1   :  { %1102 = vmatpush1.bf16.msra.mxu1 %v1101_v18 }
  0xa2   :  { %1103 = vmatprep.subr.bf16.mxu1 %v1115_v16  ;;  %v241_v16 = vrot.slane %v236_v31, %v240_v30 }
  0xa5   :  { %1105 = vmatpush1.bf16.msra.mxu1 %v1104_v27 }
 0x142   :  { %v412_v38 = vpop.f32.mrb[0].mxu0 }
 0x143   :  { %v1106_v39 = vadd.f32 %v412_v38, %v241_v16  ;;  %v554_v40 = vpop.f32.mrb[0].mxu1  ;;  %v414_v41 = vpop.f32.mrb[1].mxu0 }
 0x144   :  { %v1108_v42 = vadd.f32 %v554_v40, %v249_v35  ;;  %v1107_v43 = vadd.f32 %v414_v41, %v245_v36  ;;  %v556_v44 = vpop.f32.mrb[1].mxu1 }
 0x145   :  { %v1109_v45 = vadd.f32 %v556_v44, %v253_v37  ;;  %v559_v47 = vmax.f32 %v1106_v39, 0.0 }
 0x146   :  { %v560_v46 = vmax.f32 %v1107_v43, 0.0  ;;  %v561_v49 = vmax.f32 %v1108_v42, 0.0 }
 0x147   :  { %v562_v48 = vmax.f32 %v1109_v45, 0.0 }
 0x148   :  { %698 = vmatprep.mubr.f32.mxu0 %v560_v46 }
 0x149   :  { %788 = vmatprep.mubr.msk.f32.mxu1 %vm630_vm2, %v562_v48  ;;  %699 = vmatmul.mubr.f32.vlgmr.msra.gmra.mrb[2].mxu0 %v559_v47 }
 0x14a   :  { %769 = vmatmul.mubr.f32.vlgmr.msra.gmra.mrb[2].mxu1 %v561_v49 }
 0x21c   :  { %v821_v50 = vpop.f32.mrb[2].mxu0 }
 0x21d   :  { %v770_v51 = vpop.f32.mrb[2].mxu1  ;;  %v822_v53 = vpop.f32.mrb[3].mxu0 }
 0x21e   :  { %v823_v54 = vadd.f32 %v822_v53, %v821_v50  ;;  %v772_v55 = vpop.f32.mrb[3].mxu1 }
 0x220   :  { %v701_v56 = vadd.f32 %v823_v54, %v787_v52 }
 0x222   :  { %v771_v57 = vadd.f32 %v770_v51, %v701_v56 }
 0x224   :  { %v774_v58 = vmax.f32 %v771_v57, 0.0 }
 0x226   :  { %776 = vst.msk [vmem:[%s2008_s5] sm:$0xff] %vm775_vm3, %v774_v58 }

</bundles_post_ra>
